<compile_context>
chip_gen: v6e
topology: v6e:2x2x1
jax: 0.10.0
libtpu: 0.0.40
codegen_flags: <defaults>
</compile_context>

<pallas_src>
import functools

import jax
import jax.numpy as jnp
from jax import lax
from jax.experimental import pallas as pl
from jax.experimental.pallas import tpu as pltpu

LANES = 128
OUT_SUBLANES = 8               # per-core output tile is (1, 8, 128)
TARGET_BLOCK_BYTES = 2 * 1024 * 1024   # ~2 MiB per input pipeline buffer
FOLD_ROWS = 64                 # rows folded per fori_loop iteration (8 vregs/input)
PALLAS_MIN_ELEMS = 8 * LANES   # below one (8,128) tile -> pure-JAX fallback
# TODO(synk): in production raise PALLAS_MIN_ELEMS to ~256K elements (a one-step
# grid cannot hide kernel-entry overhead); kept tiny here so the demo below
# actually exercises the Pallas kernel.


def _tensorcores_per_chip():
    """TensorCores sharing this chip's HBM: 2 on v7x, 1 on v5e/v6e."""
    try:
        kind = jax.devices()[0].device_kind.lower()
    except Exception:
        return 1
    return 2 if ("v7" in kind or "7x" in kind) else 1


def _sublane_align(dtype):
    # Second-minor packing granularity: f32 -> 8, bf16 -> 16, int8/fp8 -> 32.
    return max(8, 32 // max(1, jnp.dtype(dtype).itemsize))


def _dice_from_sums(inter, pg_sum, weight, smooth):
    weight = jnp.asarray(weight, jnp.float32)
    smooth = jnp.float32(smooth)
    return -1.0 * weight * (2.0 * inter + smooth) / (pg_sum + smooth)


def _dice_partial_kernel(pred_ref, gt_ref, out_inter_ref, out_sum_ref,
                         acc_inter, acc_sum, *,
                         blocks_per_core, block_rows, num_blocks, total_rows,
                         need_mask, fold_rows):
    k = pl.program_id(1)  # reduction axis (per core)

    @pl.when(k == 0)
    def _():
        acc_inter[...] = jnp.zeros_like(acc_inter)
        acc_sum[...] = jnp.zeros_like(acc_sum)

    def accumulate_full_block():
        """Hot path: every row of this block is valid."""
        if fold_rows is not None:
            # Fold the block through register-resident f32 carries; no
            # accumulator VMEM traffic per input vreg.
            nfold = block_rows // fold_rows
            zero = jnp.zeros((fold_rows, LANES), jnp.float32)

            def body(j, carry):
                ci, cs = carry
                r = pl.multiple_of(j * fold_rows, fold_rows)
                ps = pred_ref[pl.ds(r, fold_rows), :].astype(jnp.float32)
                gs = gt_ref[pl.ds(r, fold_rows), :].astype(jnp.float32)
                return ci + ps * gs, cs + (ps + gs)

            ci, cs = lax.fori_loop(0, nfold, body, (zero, zero))
        else:
            # Small single-block inputs only (one grid step; perf irrelevant).
            p = pred_ref[...].astype(jnp.float32)
            g = gt_ref[...].astype(jnp.float32)
            ci = p * g
            cs = p + g
        acc_inter[...] += jnp.sum(ci, axis=0, keepdims=True)
        acc_sum[...] += jnp.sum(cs, axis=0, keepdims=True)

    if need_mask:
        c = pl.program_id(0)
        logical_block = c * blocks_per_core + k
        is_cold = logical_block >= num_blocks - 1  # edge block or clamped duplicate

        @pl.when(jnp.logical_not(is_cold))
        def _():
            accumulate_full_block()

        @pl.when(is_cold)
        def _():
            # Cold path (at most one per core per call): mask the invalid rows.
            # For a duplicated clamped block, limit <= 0 -> fully masked (so the
            # duplicate is never double-counted).
            limit = total_rows - logical_block * block_rows
            row_ids = lax.broadcasted_iota(jnp.int32, (block_rows, LANES), 0)
            valid = row_ids < limit
            zero = jnp.zeros((), jnp.float32)
            p = jnp.where(valid, pred_ref[...].astype(jnp.float32), zero)
            g = jnp.where(valid, gt_ref[...].astype(jnp.float32), zero)
            acc_inter[...] += jnp.sum(p * g, axis=0, keepdims=True)
            acc_sum[...] += jnp.sum(p + g, axis=0, keepdims=True)
    else:
        accumulate_full_block()

    @pl.when(k == pl.num_programs(1) - 1)
    def _():
        inter = jnp.sum(acc_inter[...])
        psum = jnp.sum(acc_sum[...])
        out_inter_ref[...] = jnp.full((1, OUT_SUBLANES, LANES), inter, jnp.float32)
        out_sum_ref[...] = jnp.full((1, OUT_SUBLANES, LANES), psum, jnp.float32)


def dice_loss(pred, gt, weight, smooth=1.0):
    """Pallas implementation of DiceLoss.forward. Returns an f32 scalar."""
    pred_flat = jnp.ravel(pred)
    gt_flat = jnp.ravel(gt)
    n = pred_flat.shape[0]

    if n < PALLAS_MIN_ELEMS:
        # Fused XLA reduction is strictly faster at this size.
        p32 = pred_flat.astype(jnp.float32)
        g32 = gt_flat.astype(jnp.float32)
        return _dice_from_sums(jnp.sum(p32 * g32), jnp.sum(p32) + jnp.sum(g32),
                               weight, smooth)

    rows = pl.cdiv(n, LANES)
    itemsize = max(pred_flat.dtype.itemsize, gt_flat.dtype.itemsize)
    align = max(_sublane_align(pred_flat.dtype), _sublane_align(gt_flat.dtype))
    target_rows = max(align,
                      (TARGET_BLOCK_BYTES // (LANES * itemsize)) // align * align)

    if rows <= target_rows:
        # Small inputs: one sublane-aligned block covering everything.
        block_rows = pl.cdiv(rows, align) * align
        rows_p = block_rows
    else:
        # Streaming path: no pad, partial edge block masked in-kernel.
        block_rows = target_rows
        rows_p = rows

    n_p = rows_p * LANES
    if n_p != n:
        # Only when n is not a multiple of 128 (or for small inputs rounded up
        # to the aligned single block); the large streaming path never pads.
        pred_flat = jnp.pad(pred_flat, (0, n_p - n))
        gt_flat = jnp.pad(gt_flat, (0, n_p - n))

    pred2d = pred_flat.reshape(rows_p, LANES)
    gt2d = gt_flat.reshape(rows_p, LANES)

    num_blocks = pl.cdiv(rows_p, block_rows)
    ncores = _tensorcores_per_chip()
    grid_cores = ncores if (ncores > 1 and num_blocks >= ncores) else 1
    blocks_per_core = pl.cdiv(num_blocks, grid_cores)
    need_mask = (rows_p % block_rows != 0) or (blocks_per_core * grid_cores != num_blocks)
    fold_rows = FOLD_ROWS if block_rows % FOLD_ROWS == 0 else None

    def in_index(c, k):
        # Clamp so a duplicated step on the core-parallel path never DMAs a
        # fully out-of-range block; its contribution is zeroed by the mask.
        blk = jnp.minimum(c * blocks_per_core + k, num_blocks - 1)
        return (blk, 0)

    kernel = functools.partial(
        _dice_partial_kernel,
        blocks_per_core=blocks_per_core,
        block_rows=block_rows,
        num_blocks=num_blocks,
        total_rows=rows_p,
        need_mask=need_mask,
        fold_rows=fold_rows,
    )

    lead_sem = pltpu.CORE_PARALLEL if grid_cores > 1 else pltpu.ARBITRARY

    out_inter, out_sum = pl.pallas_call(
        kernel,
        out_shape=(
            jax.ShapeDtypeStruct((grid_cores, OUT_SUBLANES, LANES), jnp.float32),
            jax.ShapeDtypeStruct((grid_cores, OUT_SUBLANES, LANES), jnp.float32),
        ),
        grid_spec=pltpu.PrefetchScalarGridSpec(
            num_scalar_prefetch=0,
            grid=(grid_cores, blocks_per_core),
            in_specs=[
                # TODO(synk): sweep pipeline_mode=pl.Buffered(3) here on v7x.
                pl.BlockSpec((block_rows, LANES), in_index),
                pl.BlockSpec((block_rows, LANES), in_index),
            ],
            out_specs=[
                pl.BlockSpec((1, OUT_SUBLANES, LANES), lambda c, k: (c, 0, 0)),
                pl.BlockSpec((1, OUT_SUBLANES, LANES), lambda c, k: (c, 0, 0)),
            ],
            scratch_shapes=[
                pltpu.VMEM((1, LANES), jnp.float32),
                pltpu.VMEM((1, LANES), jnp.float32),
            ],
        ),
        compiler_params=pltpu.CompilerParams(
            dimension_semantics=(lead_sem, pltpu.ARBITRARY),
        ),
    )(pred2d, gt2d)

    # Each per-core tile is a broadcast of that core's partial sums; pick one
    # representative element per core and combine in JAX.
    inter = jnp.sum(out_inter[:, 0, 0])
    pg_sum = jnp.sum(out_sum[:, 0, 0])
    return _dice_from_sums(inter, pg_sum, weight, smooth)


def dice_loss_ref(pred, gt, weight, smooth=1.0):
    p = jnp.ravel(pred).astype(jnp.float32)
    g = jnp.ravel(gt).astype(jnp.float32)
    inter = jnp.sum(p * g)
    return (-1.0 * jnp.asarray(weight, jnp.float32) * (2.0 * inter + smooth)
            / (jnp.sum(p) + jnp.sum(g) + smooth))


if __name__ == "__main__":
    key = jax.random.PRNGKey(0)
    ks = jax.random.split(key, 10)

    def binary(k, shape, dtype=jnp.float32):
        return (jax.random.uniform(k, shape) > 0.5).astype(dtype)

    cases = []

    # 0) Tiny input -> pure-JAX fallback path.
    cases.append((jax.nn.sigmoid(jax.random.normal(ks[0], (1, 2, 8, 8))),
                  binary(ks[1], (1, 2, 8, 8)), 1.0, 1.0))

    # 1) Small NCHW f32 (single-block kernel path).
    cases.append((jax.nn.sigmoid(jax.random.normal(ks[2], (2, 4, 16, 16))),
                  binary(ks[3], (2, 4, 16, 16)), 1.0, 1.0))

    # 2) Multi-step streaming path with a partial (masked) edge block, f32.
    cases.append((jax.nn.sigmoid(jax.random.normal(ks[4], (8, 4, 144, 128))),
                  binary(ks[5], (8, 4, 144, 128)), 0.7, 2.0))

    # 3) bf16 inputs streamed in native dtype (fold loop, no pad).
    cases.append((jax.nn.sigmoid(jax.random.normal(ks[6], (4, 8, 32, 32))).astype(jnp.bfloat16),
                  binary(ks[7], (4, 8, 32, 32), jnp.bfloat16), 1.0, 1.0))

    # 4) Flat length not a multiple of 128 (pad path).
    cases.append((jax.nn.sigmoid(jax.random.normal(ks[8], (3, 5, 7, 11))),
                  binary(ks[9], (3, 5, 7, 11)), 1.0, 1.0))

    for i, (p, g, w, s) in enumerate(cases):
        out = dice_loss(p, g, w, smooth=s)
        jax.block_until_ready(out)
        ref = dice_loss_ref(p, g, w, smooth=s)
        assert jnp.allclose(out, ref, rtol=1e-5, atol=1e-5), (i, out, ref)

    print("KERNEL_OK")
</pallas_src>

<mosaic_0001>
module attributes {stable_mosaic.version = 11 : i64} {
  func.func @_dice_partial_kernel(%arg0: i32, %arg1: i32, %arg2: memref<16x128xf32, #tpu.memory_space<vmem>>, %arg3: memref<16x128xf32, #tpu.memory_space<vmem>>, %arg4: memref<1x8x128xf32, #tpu.memory_space<vmem>>, %arg5: memref<1x8x128xf32, #tpu.memory_space<vmem>>, %arg6: memref<1x128xf32, #tpu.memory_space<vmem>>, %arg7: memref<1x128xf32, #tpu.memory_space<vmem>>) attributes {dimension_semantics = [#tpu.dimension_semantics<arbitrary>, #tpu.dimension_semantics<arbitrary>], iteration_bounds = array<i64: 1, 1>, scalar_prefetch = 0 : i64, scratch_operands = 2 : i64, tpu.core_type = #tpu.core_type<tc>, window_params = [{transform_indices = @transform_0, window_bounds = array<i64: 16, 128>}, {transform_indices = @transform_1, window_bounds = array<i64: 16, 128>}, {transform_indices = @transform_2, window_bounds = array<i64: 1, 8, 128>}, {transform_indices = @transform_3, window_bounds = array<i64: 1, 8, 128>}]} {
    %c0_i32 = arith.constant 0 : i32
    %0 = arith.cmpi eq, %arg1, %c0_i32 : i32
    %1 = arith.extui %0 : i1 to i32
    %c0_i32_0 = arith.constant 0 : i32
    %2 = arith.cmpi ne, %1, %c0_i32_0 : i32
    scf.if %2 {
      %cst_15 = arith.constant 0.000000e+00 : f32
      %20 = vector.broadcast %cst_15 : f32 to vector<1x128xf32>
      %c0_16 = arith.constant 0 : index
      %c0_17 = arith.constant 0 : index
      %21 = vector.load %arg6[%c0_16, %c0_17] : memref<1x128xf32, #tpu.memory_space<vmem>>, vector<1x128xf32>
      tpu.vector_store %arg6[%c0_16, %c0_17], %20 {strides = array<i32>} : memref<1x128xf32, #tpu.memory_space<vmem>>, vector<1x128xf32>,
      %cst_18 = arith.constant 0.000000e+00 : f32
      %22 = vector.broadcast %cst_18 : f32 to vector<1x128xf32>
      %c0_19 = arith.constant 0 : index
      %c0_20 = arith.constant 0 : index
      %23 = vector.load %arg7[%c0_19, %c0_20] : memref<1x128xf32, #tpu.memory_space<vmem>>, vector<1x128xf32>
      tpu.vector_store %arg7[%c0_19, %c0_20], %22 {strides = array<i32>} : memref<1x128xf32, #tpu.memory_space<vmem>>, vector<1x128xf32>,
    } else {
    }
    %c0 = arith.constant 0 : index
    %c0_1 = arith.constant 0 : index
    %3 = vector.load %arg2[%c0, %c0_1] : memref<16x128xf32, #tpu.memory_space<vmem>>, vector<16x128xf32>
    %c0_2 = arith.constant 0 : index
    %c0_3 = arith.constant 0 : index
    %4 = vector.load %arg3[%c0_2, %c0_3] : memref<16x128xf32, #tpu.memory_space<vmem>>, vector<16x128xf32>
    %5 = arith.mulf %3, %4 : vector<16x128xf32>
    %6 = arith.addf %3, %4 : vector<16x128xf32>
    %c0_4 = arith.constant 0 : index
    %c0_5 = arith.constant 0 : index
    %7 = vector.load %arg6[%c0_4, %c0_5] : memref<1x128xf32, #tpu.memory_space<vmem>>, vector<1x128xf32>
    %cst = arith.constant dense<0.000000e+00> : vector<128xf32>
    %8 = vector.multi_reduction <add>, %5, %cst [0] : vector<16x128xf32> to vector<128xf32>
    %9 = vector.shape_cast %8 : vector<128xf32> to vector<1x128xf32>
    %10 = arith.addf %7, %9 : vector<1x128xf32>
    %c0_6 = arith.constant 0 : index
    %c0_7 = arith.constant 0 : index
    %11 = vector.load %arg6[%c0_6, %c0_7] : memref<1x128xf32, #tpu.memory_space<vmem>>, vector<1x128xf32>
    tpu.vector_store %arg6[%c0_6, %c0_7], %10 {strides = array<i32>} : memref<1x128xf32, #tpu.memory_space<vmem>>, vector<1x128xf32>,
    %c0_8 = arith.constant 0 : index
    %c0_9 = arith.constant 0 : index
    %12 = vector.load %arg7[%c0_8, %c0_9] : memref<1x128xf32, #tpu.memory_space<vmem>>, vector<1x128xf32>
    %cst_10 = arith.constant dense<0.000000e+00> : vector<128xf32>
    %13 = vector.multi_reduction <add>, %6, %cst_10 [0] : vector<16x128xf32> to vector<128xf32>
    %14 = vector.shape_cast %13 : vector<128xf32> to vector<1x128xf32>
    %15 = arith.addf %12, %14 : vector<1x128xf32>
    %c0_11 = arith.constant 0 : index
    %c0_12 = arith.constant 0 : index
    %16 = vector.load %arg7[%c0_11, %c0_12] : memref<1x128xf32, #tpu.memory_space<vmem>>, vector<1x128xf32>
    tpu.vector_store %arg7[%c0_11, %c0_12], %15 {strides = array<i32>} : memref<1x128xf32, #tpu.memory_space<vmem>>, vector<1x128xf32>,
    %c0_i32_13 = arith.constant 0 : i32
    %17 = arith.cmpi eq, %arg1, %c0_i32_13 : i32
    %18 = arith.extui %17 : i1 to i32
    %c0_i32_14 = arith.constant 0 : i32
    %19 = arith.cmpi ne, %18, %c0_i32_14 : i32
    scf.if %19 {
      %c0_15 = arith.constant 0 : index
      %c0_16 = arith.constant 0 : index
      %20 = vector.load %arg6[%c0_15, %c0_16] : memref<1x128xf32, #tpu.memory_space<vmem>>, vector<1x128xf32>
      %21 = vector.shape_cast %20 : vector<1x128xf32> to vector<1x1x128xf32>
      %cst_17 = arith.constant dense<0.000000e+00> : vector<1xf32>
      %22 = vector.multi_reduction <add>, %21, %cst_17 [1, 2] : vector<1x1x128xf32> to vector<1xf32>
      %23 = vector.shape_cast %22 : vector<1xf32> to vector<1x1x1xf32>
      %24 = vector.extract %23[0, 0, 0] : f32 from vector<1x1x1xf32>
      %c0_18 = arith.constant 0 : index
      %c0_19 = arith.constant 0 : index
      %25 = vector.load %arg7[%c0_18, %c0_19] : memref<1x128xf32, #tpu.memory_space<vmem>>, vector<1x128xf32>
      %26 = vector.shape_cast %25 : vector<1x128xf32> to vector<1x1x128xf32>
      %cst_20 = arith.constant dense<0.000000e+00> : vector<1xf32>
      %27 = vector.multi_reduction <add>, %26, %cst_20 [1, 2] : vector<1x1x128xf32> to vector<1xf32>
      %28 = vector.shape_cast %27 : vector<1xf32> to vector<1x1x1xf32>
      %29 = vector.extract %28[0, 0, 0] : f32 from vector<1x1x1xf32>
      %30 = vector.broadcast %24 : f32 to vector<1x8x128xf32>
      %c0_21 = arith.constant 0 : index
      %c0_22 = arith.constant 0 : index
      %c0_23 = arith.constant 0 : index
      %31 = vector.load %arg4[%c0_21, %c0_22, %c0_23] : memref<1x8x128xf32, #tpu.memory_space<vmem>>, vector<1x8x128xf32>
      tpu.vector_store %arg4[%c0_21, %c0_22, %c0_23], %30 {strides = array<i32>} : memref<1x8x128xf32, #tpu.memory_space<vmem>>, vector<1x8x128xf32>,
      %32 = vector.broadcast %29 : f32 to vector<1x8x128xf32>
      %c0_24 = arith.constant 0 : index
      %c0_25 = arith.constant 0 : index
      %c0_26 = arith.constant 0 : index
      %33 = vector.load %arg5[%c0_24, %c0_25, %c0_26] : memref<1x8x128xf32, #tpu.memory_space<vmem>>, vector<1x8x128xf32>
      tpu.vector_store %arg5[%c0_24, %c0_25, %c0_26], %32 {strides = array<i32>} : memref<1x8x128xf32, #tpu.memory_space<vmem>>, vector<1x8x128xf32>,
    } else {
    }
    return
  }
  func.func @transform_0(%arg0: i32, %arg1: i32) -> (i32, i32) {
    %c1_i32 = arith.constant 1 : i32
    %0 = arith.muli %arg0, %c1_i32 : i32
    %1 = arith.addi %0, %arg1 : i32
    %c0_i32 = arith.constant 0 : i32
    %2 = arith.minsi %1, %c0_i32 : i32
    %c0_i32_0 = arith.constant 0 : i32
    %c0_i32_1 = arith.constant 0 : i32
    return %2, %c0_i32_0 : i32, i32
  }
  func.func @transform_1(%arg0: i32, %arg1: i32) -> (i32, i32) {
    %c1_i32 = arith.constant 1 : i32
    %0 = arith.muli %arg0, %c1_i32 : i32
    %1 = arith.addi %0, %arg1 : i32
    %c0_i32 = arith.constant 0 : i32
    %2 = arith.minsi %1, %c0_i32 : i32
    %c0_i32_0 = arith.constant 0 : i32
    %c0_i32_1 = arith.constant 0 : i32
    return %2, %c0_i32_0 : i32, i32
  }
  func.func @transform_2(%arg0: i32, %arg1: i32) -> (i32, i32, i32) {
    %c0_i32 = arith.constant 0 : i32
    %c0_i32_0 = arith.constant 0 : i32
    %c0_i32_1 = arith.constant 0 : i32
    return %arg0, %c0_i32, %c0_i32_0 : i32, i32, i32
  }
  func.func @transform_3(%arg0: i32, %arg1: i32) -> (i32, i32, i32) {
    %c0_i32 = arith.constant 0 : i32
    %c0_i32_0 = arith.constant 0 : i32
    %c0_i32_1 = arith.constant 0 : i32
    return %arg0, %c0_i32, %c0_i32_0 : i32, i32, i32
  }
}

</mosaic_0001>

<bundles_post_ra>
// kernel: tpu_custom_call.1
= control target key start
LH: loop header
LB: loop body
LE: loop exit
PB: predicated region body
PF: predicated region fallthrough
CT: control target
= control target key end

     0   :  { %9 = vsyncpa [#allocation5], 0  ;;  %s299_s0 = inlined_call_operand.hbm [shape: f32[16,128], index: 0, kind: input, shape index: {}]   ;;  %s300_s1 = inlined_call_operand.hbm [shape: f32[16,128], index: 1, kind: input, shape index: {}]   ;;  %s301_s2 = inlined_call_operand.hbm [shape: f32[1,8,128], index: 2, kind: output, shape index: {0}]   ;;  %s302_s3 = inlined_call_operand.hbm [shape: f32[1,8,128], index: 3, kind: output, shape index: {1}]  }
   0x1   :  { %10 = vsyncpa [#allocation8], 0 }
   0x2   :  { %11 = vsyncpa [#allocation6], 0 }
   0x3   :  { %12 = vsyncpa [#allocation11], 0  ;;  %s260_s12 = smov [#allocation4]  }
   0x4   :  { %s24_s13 = sshll.u32 %s260_s12, 4  ;;  %s25_s13 = int_to_ptr.vmem [resolvable:$true] %s24_s13 }
   0x5   :  { %s180_s14 = scalar_lea.vmem %s25_s13, 256  ;;  %p185_p1 = scmp.lt.s32.totalorder %s25_s13, %s25_s13 }
   0x6   :  { %p181_p0 = scmp.ne.s32.totalorder %s25_s13, %s180_s14  ;;  %p186_p2 = scmp.lt.s32.totalorder %s180_s14, %s180_s14 }
   0x8   :  { %p187_p3 = por %p186_p2, %p185_p1 }
   0xa   :  { %p188_p4 = pnand %p187_p3, %p181_p0 }
   0xc   :  { %191 = shalt.err (!%p188_p4)
}
   0xd   :  { %s261_s15 = smov 128   ;;  %s262_s16 = smov 8  }
   0xe   :  { %30 = dma.hbm_to_vmem [thread:$0]  %s299_s0, 256, %s25_s13, [#allocation5], %s261_s15, %s261_s15, %s262_s16  }
   0xf   :  { %s263_s19 = smov [#allocation7]  }
  0x10   :  { %s42_s20 = sshll.u32 %s263_s19, 4  ;;  %s43_s20 = int_to_ptr.vmem [resolvable:$true] %s42_s20 }
  0x11   :  { %s200_s21 = scalar_lea.vmem %s43_s20, 256  ;;  %p205_p6 = scmp.lt.s32.totalorder %s43_s20, %s43_s20 }
  0x12   :  { %p201_p5 = scmp.ne.s32.totalorder %s43_s20, %s200_s21  ;;  %p206_p7 = scmp.lt.s32.totalorder %s200_s21, %s200_s21 }
  0x14   :  { %p207_p8 = por %p206_p7, %p205_p6 }
  0x16   :  { %p208_p9 = pnand %p207_p8, %p201_p5 }
  0x18   :  { %211 = shalt.err (!%p208_p9)
}
  0x19   :  { %48 = dma.hbm_to_vmem [thread:$0]  %s300_s1, 256, %s43_s20, [#allocation8], %s261_s15, %s261_s15, %s262_s16  }
  0x1a   :  { %252 = dma.done.wait [#allocation5], 256  }
  0x1b   :  { %253 = vsyncadd [#allocation5], 4294967040 }
  0x1c   :  { %254 = dma.done.wait [#allocation8], 256  }
  0x1d   :  { %255 = vsyncadd [#allocation8], 4294967040  ;;  %v264_v0 = vmov 0.0   ;;  %v69_v1 = vld [vmem:[#allocation4] sm:$0xff]  ;;  %v70_v2 = vld [vmem:[#allocation4 + $0x8] sm:$0xff]  ;;  %vm101_vm0 = vcmask 1040384  }
  0x1e   :  { %67 = vst [vmem:[#allocation2] sm:$0x1] %v264_v0  ;;  %68 = vst [vmem:[#allocation3] sm:$0x1] %v264_v0  ;;  %v71_v3 = vld [vmem:[#allocation7] sm:$0xff]  ;;  %v72_v4 = vld [vmem:[#allocation7 + $0x8] sm:$0xff] }
  0x1f   :  { %v73_v5 = vmul.f32 %v71_v3, %v69_v1  ;;  %v75_v6 = vadd.f32 %v71_v3, %v69_v1  ;;  %v74_v7 = vmul.f32 %v72_v4, %v70_v2  ;;  %v76_v8 = vadd.f32 %v72_v4, %v70_v2  ;;  %s265_s0 = smov [#allocation9]   ;;  %s266_s25 = smov [#allocation10]  }
  0x20   :  { %s133_s1 = sshll.u32 %s265_s0, 4  ;;  %s143_s26 = sshll.u32 %s266_s25, 4  ;;  %s134_s1 = int_to_ptr.vmem [resolvable:$true] %s133_s1  ;;  %s144_s26 = int_to_ptr.vmem [resolvable:$true] %s143_s26 }
  0x21   :  { %v78_v9 = vadd.f32 %v74_v7, %v73_v5  ;;  %v88_v10 = vadd.f32 %v76_v8, %v75_v6  ;;  %s212_s27 = scalar_lea.vmem %s134_s1, 128  ;;  %p217_p11 = scmp.lt.s32.totalorder %s134_s1, %s134_s1 }
  0x22   :  { %p213_p10 = scmp.ne.s32.totalorder %s134_s1, %s212_s27  ;;  %p218_p12 = scmp.lt.s32.totalorder %s212_s27, %s212_s27 }
  0x23   :  { %v79_v11 = vrot.slane %v78_v9, 4  ;;  %v89_v12 = vrot.slane %v88_v10, 4 }
  0x24   :  { %p219_p13 = por %p218_p12, %p217_p11 }
  0x25   :  { %v80_v13 = vadd.f32 %v79_v11, %v78_v9  ;;  %v90_v14 = vadd.f32 %v89_v12, %v88_v10  ;;  %v77_v21 = vld [vmem:[#allocation2] sm:$0x1]  ;;  %v87_v22 = vld [vmem:[#allocation3] sm:$0x1] }
  0x26   :  { %p220_p0 = pnand %p219_p13, %p213_p10 }
  0x27   :  { %v81_v15 = vrot.slane %v80_v13, 2  ;;  %v91_v16 = vrot.slane %v90_v14, 2 }
  0x29   :  { %v82_v17 = vadd.f32 %v81_v15, %v80_v13  ;;  %v92_v18 = vadd.f32 %v91_v16, %v90_v14 }
  0x2b   :  { %v83_v19 = vrot.slane %v82_v17, 1  ;;  %v93_v20 = vrot.slane %v92_v18, 1 }
  0x2d   :  { %v84_v23 = vadd.f32 %v83_v19, %v82_v17  ;;  %v94_v24 = vadd.f32 %v93_v20, %v92_v18 }
  0x2f   :  { %v85_v25 = vadd.f32 %v84_v23, %v77_v21  ;;  %v95_v26 = vadd.f32 %v94_v24, %v87_v22 }
  0x31   :  { %86 = vst [vmem:[#allocation2] sm:$0x1] %v85_v25  ;;  %96 = vst [vmem:[#allocation3] sm:$0x1] %v95_v26 }
  0x38   :  { %v100_v27 = vld [vmem:[#allocation2] sm:$0x1]  ;;  %v112_v28 = vld [vmem:[#allocation3] sm:$0x1] }
  0x39   :  { %v102_v29 = vsel %vm101_vm0, %v100_v27, 0.0  ;;  %v113_v30 = vsel %vm101_vm0, %v112_v28, 0.0 }
  0x3a   :  { %103 = vadd.xlane.f32.xlu0 %v102_v29 }
  0x3e   :  { %114 = vadd.xlane.f32.xlu0 %v113_v30 }
  0xc3   :  { %v104_v31 = vpop.xlane.xlu0 %103 }
  0xc4   :  { %v105_v32 = vrot.slane %v104_v31, 4 }
  0xc6   :  { %v106_v33 = vadd.f32 %v105_v32, %v104_v31 }
  0xc7   :  { %v115_v34 = vpop.xlane.xlu0 %114 }
  0xc8   :  { %v107_v35 = vrot.slane %v106_v33, 2  ;;  %v116_v36 = vrot.slane %v115_v34, 4 }
  0xca   :  { %v117_v37 = vadd.f32 %v116_v36, %v115_v34  ;;  %v108_v38 = vadd.f32 %v107_v35, %v106_v33 }
  0xcc   :  { %v118_v39 = vrot.slane %v117_v37, 2  ;;  %v109_v40 = vrot.slane %v108_v38, 1 }
  0xce   :  { %v119_v41 = vadd.f32 %v118_v39, %v117_v37  ;;  %v110_v42 = vadd.f32 %v109_v40, %v108_v38 }
  0xd0   :  { %161 = vpush %v110_v42  ;;  %v120_v43 = vrot.slane %v119_v41, 1 }
  0xd2   :  { %v121_v44 = vadd.f32 %v120_v43, %v119_v41 }
  0xd4   :  { %163 = vpush %v121_v44 }
 0x101   :  { %s162_s24 = spop %161 }
 0x102   :  { %v123_v45 = vstv %s162_s24 }
 0x103   :  { %124 = vst [vmem:[#allocation9] sm:$0xff] %v123_v45 }
 0x104   :  { %223 = shalt.err (!%p220_p0)
}
 0x105   :  { %136 = dma.vmem_to_hbm [thread:$0]  %s134_s1, 128, %s301_s2, [#allocation6]  }
 0x106   :  { %s164_s30 = spop %163  ;;  %s232_s4 = scalar_lea.vmem %s144_s26, 128 }
 0x107   :  { %v125_v46 = vstv %s164_s30  ;;  %p233_p1 = scmp.ne.s32.totalorder %s144_s26, %s232_s4  ;;  %p237_p2 = scmp.lt.s32.totalorder %s144_s26, %s144_s26 }
 0x108   :  { %126 = vst [vmem:[#allocation10] sm:$0xff] %v125_v46  ;;  %p238_p3 = scmp.lt.s32.totalorder %s232_s4, %s232_s4 }
 0x10a   :  { %p239_p4 = por %p238_p3, %p237_p2 }
 0x10c   :  { %p240_p5 = pnand %p239_p4, %p233_p1 }
 0x10e   :  { %243 = shalt.err (!%p240_p5)
}
 0x10f   :  { %146 = dma.vmem_to_hbm [thread:$0]  %s144_s26, 128, %s302_s3, [#allocation11]  }
 0x110   :  { %256 = dma.done.wait [#allocation6], 128  }
 0x111   :  { %257 = vsyncadd [#allocation6], 4294967168 }
 0x112   :  { %258 = dma.done.wait [#allocation11], 128  }
 0x113   :  { %259 = vsyncadd [#allocation11], 4294967168 }
 0x114   :  { %153 = vsyncpa [#allocation5], 1 }
 0x115   :  { %154 = vsyncpa [#allocation8], 1 }
 0x116   :  { %155 = vsyncpa [#allocation6], 1 }
 0x117   :  { %156 = vsyncpa [#allocation11], 1 }

</bundles_post_ra>
